<compile_context>
chip_gen: v6e
topology: v6e:2x2x1
jax: 0.10.0
libtpu: 0.0.40
codegen_flags: <defaults>
</compile_context>

<pallas_src>
import math
import functools

import jax
import jax.numpy as jnp
from jax.experimental import pallas as pl
from jax.experimental.pallas import tpu as pltpu

_INV_SQRT2 = 1.0 / math.sqrt(2.0)
_MiB = 1024 * 1024


def _round_up(v, m):
    return ((v + m - 1) // m) * m


def _vmem_capacity_bytes():
    """Physical VMEM of the attached TPU (128 MiB v5e/v6e, 64 MiB v7x)."""
    try:
        cap = getattr(pltpu.get_tpu_info(), "vmem_capacity_bytes", None)
        if cap:
            return int(cap)
    except Exception:
        pass
    return 64 * _MiB  # conservative fallback (v7x-sized VMEM)


def _clamp_vmem(need, cap, headroom):
    limit = int(max(32 * _MiB, need * 1.4))
    limit = min(limit, cap - headroom)
    return max(limit, 32 * _MiB)


def _gelu_f32(h, approximate):
    if approximate:
        # tanh approximation: tanh runs on the EUP slot (nearly free next to
        # the MXU), unlike the long erf VPU polynomial.
        c = math.sqrt(2.0 / math.pi)
        return 0.5 * h * (1.0 + jnp.tanh(c * (h + 0.044715 * h * h * h)))
    # exact GELU, matches torch.nn.GELU(approximate='none')
    return 0.5 * h * (1.0 + jax.lax.erf(h * _INV_SQRT2))


# --------------------------------- kernels ---------------------------------

def _mlp_resident_kernel(x_ref, w1_ref, b1_ref, w2_ref, b2_ref, o_ref, *,
                         approximate_gelu):
    """Weights fully VMEM-resident (constant index_maps): one fused pass."""
    h = jnp.dot(x_ref[...], w1_ref[...], preferred_element_type=jnp.float32)
    h = h + b1_ref[...].astype(jnp.float32)
    h = _gelu_f32(h, approximate_gelu)
    y = jnp.dot(h.astype(w2_ref.dtype), w2_ref[...],
                preferred_element_type=jnp.float32)
    y = y + b2_ref[...].astype(jnp.float32)
    # dropout with drop_rate=0.0 (inference) is the identity.
    o_ref[...] = y.astype(o_ref.dtype)


def _mlp_streaming_kernel(x_ref, w1_ref, b1_ref, w2_ref, b2_ref, o_ref,
                          acc_ref, *, approximate_gelu):
    """Hidden dim tiled on a reduction axis; fc2 partials accumulated in f32."""
    kh = pl.program_id(1)

    @pl.when(kh == 0)
    def _():
        # Init the accumulator directly with b2 (drops one (bm, dout) VPU add
        # from the finalize critical path).
        acc_ref[...] = jnp.broadcast_to(b2_ref[...].astype(jnp.float32),
                                        acc_ref.shape)

    # fc1 partial: x @ W1[:, h_tile]  (native-dtype MXU, f32 accumulate)
    h = jnp.dot(x_ref[...], w1_ref[...], preferred_element_type=jnp.float32)
    h = h + b1_ref[...].astype(jnp.float32)
    h = _gelu_f32(h, approximate_gelu)

    # fc2 partial: gelu(h) @ W2[h_tile, :], accumulated across H tiles
    acc_ref[...] += jnp.dot(h.astype(w2_ref.dtype), w2_ref[...],
                            preferred_element_type=jnp.float32)

    @pl.when(kh == pl.num_programs(1) - 1)
    def _():
        # dropout with drop_rate=0.0 (inference) is the identity.
        o_ref[...] = acc_ref[...].astype(o_ref.dtype)


# --------------------------------- wrapper ---------------------------------

def prepare_mlp_params(w1, b1, w2, b2, weight_dtype=None):
    """Pad weights/biases to lane-dense 128-multiples ONCE, outside the
    per-call path (avoids re-materializing padded weight copies every call).
    Optionally cast the weights to bf16 (full-rate MXU, half the weight HBM /
    VMEM footprint); kernel accumulation stays f32 either way.
    Returns ((w1_p, b1_p, w2_p, b2_p), out_features)."""
    din, hid = w1.shape
    dout = w2.shape[1]
    din_p = _round_up(din, 128)
    hid_p = _round_up(hid, 128)
    dout_p = _round_up(dout, 128)
    if weight_dtype is not None:
        w1 = w1.astype(weight_dtype)
        w2 = w2.astype(weight_dtype)
    w1_p = jnp.pad(w1, ((0, din_p - din), (0, hid_p - hid)))
    b1_p = jnp.pad(b1, (0, hid_p - hid)).reshape(1, hid_p)
    w2_p = jnp.pad(w2, ((0, hid_p - hid), (0, dout_p - dout)))
    b2_p = jnp.pad(b2, (0, dout_p - dout)).reshape(1, dout_p)
    return (w1_p, b1_p, w2_p, b2_p), dout


@functools.partial(
    jax.jit,
    static_argnames=("out_features", "block_rows", "block_hidden",
                     "approximate_gelu"))
def mlp_pallas(x, w1_p, b1_p, w2_p, b2_p, *, out_features,
               block_rows=512, block_hidden=512, approximate_gelu=False):
    """x: [..., Din]; (w1_p, b1_p, w2_p, b2_p) from prepare_mlp_params()."""
    orig_shape = x.shape
    din = orig_shape[-1]
    din_p, hid_p = w1_p.shape
    dout_p = w2_p.shape[1]
    dout = out_features

    x2d = x.reshape(-1, din)
    n = x2d.shape[0]

    x_isz = jnp.dtype(x.dtype).itemsize
    w_isz = jnp.dtype(w1_p.dtype).itemsize
    b_isz = jnp.dtype(b1_p.dtype).itemsize

    vmem_cap = _vmem_capacity_bytes()
    headroom = 12 * _MiB

    # ---- row tiling (mult of 8; rows zero-padded, sliced off afterwards) ----
    bm = min(block_rows, _round_up(n, 8))
    n_pad = _round_up(n, bm)

    # ---- resident vs. streaming decision (weights double-buffered worst case)
    weight_bytes = ((din_p * hid_p + hid_p * dout_p) * w_isz
                    + (hid_p + dout_p) * b_isz)
    resident_need = 2 * weight_bytes + 2 * bm * (din_p + dout_p) * x_isz
    use_resident = resident_need <= int(0.6 * vmem_cap)

    flops = 2 * n_pad * (din_p * hid_p + hid_p * dout_p)
    trans = n_pad * hid_p

    if use_resident:
        # Megacore: give the "parallel" row axis >=2 blocks when rows allow so
        # v7x's two TensorCores both get work.  Harmless on this path since
        # resident weights are DMA'd once regardless of the number of blocks.
        if n_pad // bm < 2 and n > 8:
            bm = max(8, _round_up(pl.cdiv(n, 2), 8))
            n_pad = _round_up(n, bm)
        vmem_need = 2 * weight_bytes + 2 * bm * (din_p + dout_p) * x_isz
        vmem_limit = _clamp_vmem(vmem_need, vmem_cap, headroom)

        cost = pl.CostEstimate(
            flops=flops,
            transcendentals=trans,
            bytes_accessed=(n_pad * din_p * x_isz + weight_bytes
                            + n_pad * dout_p * x_isz))

        x_p = jnp.pad(x2d, ((0, n_pad - n), (0, din_p - din)))
        kernel = functools.partial(_mlp_resident_kernel,
                                   approximate_gelu=approximate_gelu)
        out2d = pl.pallas_call(
            kernel,
            out_shape=jax.ShapeDtypeStruct((n_pad, dout_p), x.dtype),
            grid_spec=pltpu.PrefetchScalarGridSpec(
                num_scalar_prefetch=0,
                grid=(n_pad // bm,),
                in_specs=[
                    pl.BlockSpec((bm, din_p), lambda i: (i, 0)),      # x rows
                    pl.BlockSpec((din_p, hid_p), lambda i: (0, 0)),   # W1 (resident)
                    pl.BlockSpec((1, hid_p), lambda i: (0, 0)),       # b1 (resident)
                    pl.BlockSpec((hid_p, dout_p), lambda i: (0, 0)),  # W2 (resident)
                    pl.BlockSpec((1, dout_p), lambda i: (0, 0)),      # b2 (resident)
                ],
                out_specs=pl.BlockSpec((bm, dout_p), lambda i: (i, 0)),
            ),
            compiler_params=pltpu.CompilerParams(
                dimension_semantics=("parallel",),
                vmem_limit_bytes=vmem_limit),
            cost_estimate=cost,
        )(x_p, w1_p, b1_p, w2_p, b2_p)

    else:
        # Hidden tile: the largest multiple of 128 that divides hid_p and is
        # <= block_hidden (bounds padding waste to <128 hidden rows).
        bh = 128
        cand = max(128, (min(block_hidden, hid_p) // 128) * 128)
        while cand >= 128:
            if hid_p % cand == 0:
                bh = cand
                break
            cand -= 128

        def stream_need(bm_):
            return (2 * (bm_ * din_p * x_isz             # x tile
                         + din_p * bh * w_isz            # W1 tile
                         + bh * b_isz                    # b1 tile
                         + bh * dout_p * w_isz           # W2 tile
                         + dout_p * b_isz                # b2
                         + bm_ * dout_p * x_isz)         # out tile
                    + bm_ * dout_p * 4)                  # f32 accumulator

        while stream_need(bm) > int(0.7 * vmem_cap) and bm > 8:
            bm = max(8, _round_up(bm // 2, 8))
        n_pad = _round_up(n, bm)
        n_blocks = n_pad // bm
        vmem_limit = _clamp_vmem(stream_need(bm), vmem_cap, headroom)

        cost = pl.CostEstimate(
            flops=flops,
            transcendentals=trans,
            bytes_accessed=(n_pad * din_p * x_isz
                            + n_blocks * weight_bytes    # weights re-streamed per row block
                            + n_pad * dout_p * x_isz))

        x_p = jnp.pad(x2d, ((0, n_pad - n), (0, din_p - din)))
        kernel = functools.partial(_mlp_streaming_kernel,
                                   approximate_gelu=approximate_gelu)
        out2d = pl.pallas_call(
            kernel,
            out_shape=jax.ShapeDtypeStruct((n_pad, dout_p), x.dtype),
            grid_spec=pltpu.PrefetchScalarGridSpec(
                num_scalar_prefetch=0,
                grid=(n_pad // bm, hid_p // bh),          # rows parallel, H reduction
                in_specs=[
                    pl.BlockSpec((bm, din_p), lambda i, kh: (i, 0)),     # x rows
                    pl.BlockSpec((din_p, bh), lambda i, kh: (0, kh)),    # W1 tile
                    pl.BlockSpec((1, bh), lambda i, kh: (0, kh)),        # b1 tile
                    pl.BlockSpec((bh, dout_p), lambda i, kh: (kh, 0)),   # W2 tile
                    pl.BlockSpec((1, dout_p), lambda i, kh: (0, 0)),     # b2
                ],
                out_specs=pl.BlockSpec((bm, dout_p), lambda i, kh: (i, 0)),
                scratch_shapes=[pltpu.VMEM((bm, dout_p), jnp.float32)],
            ),
            compiler_params=pltpu.CompilerParams(
                dimension_semantics=("parallel", "arbitrary"),
                vmem_limit_bytes=vmem_limit),
            cost_estimate=cost,
        )(x_p, w1_p, b1_p, w2_p, b2_p)

    out2d = out2d[:n, :dout]
    return out2d.reshape(*orig_shape[:-1], dout)


def mlp_pallas_unprepared(x, w1, b1, w2, b2, **kwargs):
    """One-shot convenience wrapper.  In steady state prefer
    prepare_mlp_params() + mlp_pallas() so weight padding is not repeated."""
    params, dout = prepare_mlp_params(w1, b1, w2, b2)
    return mlp_pallas(x, *params, out_features=dout, **kwargs)


def init_mlp_params(key, in_features, hidden_features, out_features,
                    dtype=jnp.float32):
    """Deterministic init mimicking torch.nn.Linear (uniform +-1/sqrt(fan_in)).
    Weights are returned already transposed for row-major matmul."""
    k1, k2, k3, k4 = jax.random.split(key, 4)
    bound1 = 1.0 / math.sqrt(in_features)
    bound2 = 1.0 / math.sqrt(hidden_features)
    w1 = jax.random.uniform(k1, (in_features, hidden_features), dtype,
                            -bound1, bound1)
    b1 = jax.random.uniform(k2, (hidden_features,), dtype, -bound1, bound1)
    w2 = jax.random.uniform(k3, (hidden_features, out_features), dtype,
                            -bound2, bound2)
    b2 = jax.random.uniform(k4, (out_features,), dtype, -bound2, bound2)
    return w1, b1, w2, b2


# TODO(synk): dropout with drop_rate > 0 (training mode) would need an
# in-kernel PRNG mask (pltpu.prng_seed / stateful_bernoulli); the module's
# default p=0.0 / eval-mode path is the identity and is what is implemented.

if __name__ == "__main__":
    # Small shapes consistent with the module: tokens of dim in_features.
    batch, seq = 2, 8
    in_features, hidden_features, out_features = 32, 64, 32

    key = jax.random.PRNGKey(0)
    kx, kp = jax.random.split(key)
    x = jax.random.normal(kx, (batch, seq, in_features), jnp.float32)
    w1, b1, w2, b2 = init_mlp_params(kp, in_features, hidden_features,
                                     out_features)

    # Pad weights once, outside the per-call path.
    params, dout = prepare_mlp_params(w1, b1, w2, b2)

    out = mlp_pallas(x, *params, out_features=dout)
    out = jax.block_until_ready(out)

    # Reference check in plain JAX (fc1 -> exact GELU -> fc2; dropout p=0 = id).
    h_ref = x @ w1 + b1
    h_ref = 0.5 * h_ref * (1.0 + jax.lax.erf(h_ref / math.sqrt(2.0)))
    y_ref = h_ref @ w2 + b2
    assert out.shape == (batch, seq, out_features)
    assert jnp.allclose(out, y_ref, atol=1e-5, rtol=1e-5), float(
        jnp.max(jnp.abs(out - y_ref)))

    print("KERNEL_OK")
</pallas_src>

<mosaic_0001>
module attributes {stable_mosaic.version = 11 : i64} {
  func.func @_mlp_resident_kernel(%arg0: i32, %arg1: memref<8x128xf32, #tpu.memory_space<vmem>>, %arg2: memref<128x128xf32, #tpu.memory_space<vmem>>, %arg3: memref<1x128xf32, #tpu.memory_space<vmem>>, %arg4: memref<128x128xf32, #tpu.memory_space<vmem>>, %arg5: memref<1x128xf32, #tpu.memory_space<vmem>>, %arg6: memref<8x128xf32, #tpu.memory_space<vmem>>) attributes {dimension_semantics = [#tpu.dimension_semantics<parallel>], iteration_bounds = array<i64: 2>, scalar_prefetch = 0 : i64, scratch_operands = 0 : i64, tpu.core_type = #tpu.core_type<tc>, window_params = [{transform_indices = @transform_0, window_bounds = array<i64: 8, 128>}, {pipeline_mode = #tpu.pipeline_mode<synchronous>, transform_indices = @transform_1, window_bounds = array<i64: 128, 128>}, {pipeline_mode = #tpu.pipeline_mode<synchronous>, transform_indices = @transform_2, window_bounds = array<i64: 1, 128>}, {pipeline_mode = #tpu.pipeline_mode<synchronous>, transform_indices = @transform_3, window_bounds = array<i64: 128, 128>}, {pipeline_mode = #tpu.pipeline_mode<synchronous>, transform_indices = @transform_4, window_bounds = array<i64: 1, 128>}, {transform_indices = @transform_5, window_bounds = array<i64: 8, 128>}]} {
    %c0 = arith.constant 0 : index
    %c0_0 = arith.constant 0 : index
    %0 = vector.load %arg1[%c0, %c0_0] : memref<8x128xf32, #tpu.memory_space<vmem>>, vector<8x128xf32>
    %c0_1 = arith.constant 0 : index
    %c0_2 = arith.constant 0 : index
    %1 = vector.load %arg2[%c0_1, %c0_2] : memref<128x128xf32, #tpu.memory_space<vmem>>, vector<128x128xf32>
    %cst = arith.constant dense<0.000000e+00> : vector<8x128xf32>
    %2 = tpu.matmul %0, %1, %cst {dimension_numbers = #tpu.dot_dimension_numbers<[1], [0], [0], [1], [0, 0, 1, 1], [], []>} : vector<8x128xf32>, vector<128x128xf32>, vector<8x128xf32> -> vector<8x128xf32>
    %c0_3 = arith.constant 0 : index
    %c0_4 = arith.constant 0 : index
    %3 = vector.load %arg3[%c0_3, %c0_4] : memref<1x128xf32, #tpu.memory_space<vmem>>, vector<1x128xf32>
    %4 = vector.broadcast %3 : vector<1x128xf32> to vector<8x128xf32>
    %5 = arith.addf %2, %4 : vector<8x128xf32>
    %cst_5 = arith.constant 5.000000e-01 : f32
    %6 = vector.broadcast %cst_5 : f32 to vector<8x128xf32>
    %7 = arith.mulf %6, %5 : vector<8x128xf32>
    %cst_6 = arith.constant 0.707106769 : f32
    %8 = vector.broadcast %cst_6 : f32 to vector<8x128xf32>
    %9 = arith.mulf %5, %8 : vector<8x128xf32>
    %10 = math.erf %9 : vector<8x128xf32>
    %cst_7 = arith.constant 1.000000e+00 : f32
    %11 = vector.broadcast %cst_7 : f32 to vector<8x128xf32>
    %12 = arith.addf %11, %10 : vector<8x128xf32>
    %13 = arith.mulf %7, %12 : vector<8x128xf32>
    %c0_8 = arith.constant 0 : index
    %c0_9 = arith.constant 0 : index
    %14 = vector.load %arg4[%c0_8, %c0_9] : memref<128x128xf32, #tpu.memory_space<vmem>>, vector<128x128xf32>
    %cst_10 = arith.constant dense<0.000000e+00> : vector<8x128xf32>
    %15 = tpu.matmul %13, %14, %cst_10 {dimension_numbers = #tpu.dot_dimension_numbers<[1], [0], [0], [1], [0, 0, 1, 1], [], []>} : vector<8x128xf32>, vector<128x128xf32>, vector<8x128xf32> -> vector<8x128xf32>
    %c0_11 = arith.constant 0 : index
    %c0_12 = arith.constant 0 : index
    %16 = vector.load %arg5[%c0_11, %c0_12] : memref<1x128xf32, #tpu.memory_space<vmem>>, vector<1x128xf32>
    %17 = vector.broadcast %16 : vector<1x128xf32> to vector<8x128xf32>
    %18 = arith.addf %15, %17 : vector<8x128xf32>
    %c0_13 = arith.constant 0 : index
    %c0_14 = arith.constant 0 : index
    %19 = vector.load %arg6[%c0_13, %c0_14] : memref<8x128xf32, #tpu.memory_space<vmem>>, vector<8x128xf32>
    tpu.vector_store %arg6[%c0_13, %c0_14], %18 {strides = array<i32>} : memref<8x128xf32, #tpu.memory_space<vmem>>, vector<8x128xf32>,
    return
  }
  func.func @transform_0(%arg0: i32) -> (i32, i32) {
    %c0_i32 = arith.constant 0 : i32
    %c0_i32_0 = arith.constant 0 : i32
    return %arg0, %c0_i32 : i32, i32
  }
  func.func @transform_1(%arg0: i32) -> (i32, i32) {
    %c0_i32 = arith.constant 0 : i32
    %c0_i32_0 = arith.constant 0 : i32
    %c0_i32_1 = arith.constant 0 : i32
    return %c0_i32, %c0_i32_0 : i32, i32
  }
  func.func @transform_2(%arg0: i32) -> (i32, i32) {
    %c0_i32 = arith.constant 0 : i32
    %c0_i32_0 = arith.constant 0 : i32
    %c0_i32_1 = arith.constant 0 : i32
    return %c0_i32, %c0_i32_0 : i32, i32
  }
  func.func @transform_3(%arg0: i32) -> (i32, i32) {
    %c0_i32 = arith.constant 0 : i32
    %c0_i32_0 = arith.constant 0 : i32
    %c0_i32_1 = arith.constant 0 : i32
    return %c0_i32, %c0_i32_0 : i32, i32
  }
  func.func @transform_4(%arg0: i32) -> (i32, i32) {
    %c0_i32 = arith.constant 0 : i32
    %c0_i32_0 = arith.constant 0 : i32
    %c0_i32_1 = arith.constant 0 : i32
    return %c0_i32, %c0_i32_0 : i32, i32
  }
  func.func @transform_5(%arg0: i32) -> (i32, i32) {
    %c0_i32 = arith.constant 0 : i32
    %c0_i32_0 = arith.constant 0 : i32
    return %arg0, %c0_i32 : i32, i32
  }
}

</mosaic_0001>

<bundles_post_ra>
// kernel: mlp_pallas.1
= control target key start
LH: loop header
LB: loop body
LE: loop exit
PB: predicated region body
PF: predicated region fallthrough
CT: control target
= control target key end

     0   :  { %10 = vsyncpa [#allocation3], 0  ;;  %s885_s0 = inlined_call_operand.vmem [shape: f32[16,128], index: 0, kind: input, shape index: {}]   ;;  %s886_s1 = inlined_call_operand.hbm [shape: f32[128,128], index: 1, kind: input, shape index: {}]   ;;  %s887_s2 = inlined_call_operand.vmem [shape: f32[1,128], index: 2, kind: input, shape index: {}]   ;;  %s888_s3 = inlined_call_operand.hbm [shape: f32[128,128], index: 3, kind: input, shape index: {}]   ;;  %s889_s4 = inlined_call_operand.vmem [shape: f32[1,128], index: 4, kind: input, shape index: {}]   ;;  %s890_s5 = inlined_call_operand.vmem [shape: f32[16,128], index: 5, kind: output, shape index: {}]  }
   0x1   :  { %11 = vsyncpa [#allocation5], 0  ;;  %s776_s18 = smov 0  }
   0x2 LB: > { %s782_s19 = sadd.s32 4294967295, %s738_s18   ;;  %p520_p0 = scmp.ge.s32.totalorder %s738_s18, 1  ;;  %s738_s18 = sphi %s776_s18, %s17_s18  }
   0x3   : > { %p158_p1 = scmp.lt.s32.totalorder %s738_s18, 3  ;;  %s740_s20 = smov [#allocation2]  }
   0x4   : > { %s170_s21 = sshll.u32 %s740_s20, 4  ;;  %p652_p3 = scmp.eq.s32.totalorder %s782_s19, 0  ;;  %s171_s21 = int_to_ptr.vmem [resolvable:$true] %s170_s21 }
   0x5   : > { %p786_p2 = pnand %p520_p0, %p158_p1  ;;  %s741_s23 = smov [#allocation4]  }
   0x6   : > { %s186_s24 = sshll.u32 %s741_s23, 4  ;;  %s683_s26 = scalar_lea.vmem %s171_s21, 2048  ;;  %s187_s24 = int_to_ptr.vmem [resolvable:$true] %s186_s24 }
   0x7   : > { %p645_p4 = pneg %p786_p2  ;;  %p684_p7 = scmp.ne.s32.totalorder %s171_s21, %s683_s26 }
   0x8   : > { %p691_p10 = scmp.lt.s32.totalorder %s171_s21, %s171_s21  ;;  %p692_p11 = scmp.lt.s32.totalorder %s683_s26, %s683_s26 }
   0x9   : > { %p795_p5 = pnand %p652_p3, %p645_p4 }
   0xa   : > { %p693_p12 = por %p692_p11, %p691_p10 }
   0xb   : > { %p674_p6 = pneg %p795_p5 }
   0xd   : > { %p686_p8 = pnand %p684_p7, %p674_p6 }
   0xf   : > { %p687_p9 = pneg %p686_p8 }
  0x11   : > { %p694_p13 = pnand %p693_p12, %p687_p9 }
  0x13   : > { %697 = shalt.err (!%p694_p13)
}
  0x14   : > { %s742_s27 = smov 128   ;;  %s743_s28 = smov 8  }
  0x15   : > { %648 = dma.hbm_to_vmem [thread:$0]  (!%p795_p5), %s886_s1, 2048, %s171_s21, [#allocation3], %s742_s27, %s742_s27, %s743_s28  }
  0x16   : > { %s709_s6 = scalar_lea.vmem %s187_s24, 2048  ;;  %p717_p7 = scmp.lt.s32.totalorder %s187_s24, %s187_s24 }
  0x17   : > { %p710_p0 = scmp.ne.s32.totalorder %s187_s24, %s709_s6  ;;  %p718_p8 = scmp.lt.s32.totalorder %s709_s6, %s709_s6 }
  0x19   : > { %p712_p1 = pnand %p710_p0, %p674_p6  ;;  %p719_p10 = por %p718_p8, %p717_p7 }
  0x1b   : > { %p713_p4 = pneg %p712_p1 }
  0x1d   : > { %p720_p9 = pnand %p719_p10, %p713_p4 }
  0x1f   : > { %723 = shalt.err (!%p720_p9)
}
  0x20   : > { %651 = dma.hbm_to_vmem [thread:$0]  (!%p795_p5), %s888_s3, 2048, %s187_s24, [#allocation5], %s742_s27, %s742_s27, %s743_s28  }
  0x21   : > { %212 = sbr.rel (%p786_p2) target bundleno = 486 (0x1e6), region = 40 }
  0x26   : > { %729 = dma.done.wait (%p652_p3), [#allocation3], 2048  }
  0x27   : > { %731 = vsyncadd (%p652_p3), [#allocation3], 4294965248 }
  0x28   : > { %733 = dma.done.wait (%p652_p3), [#allocation5], 2048  }
  0x29   : > { %735 = vsyncadd (%p652_p3), [#allocation5], 4294965248  ;;  %v744_v0 = vmov 0.0   ;;  %vm745_vm0 = vmmov 0   ;;  %v266_v1 = vld [vmem:[#allocation2 + $0x78] sm:$0xff]  ;;  %v265_v2 = vld [vmem:[#allocation2 + $0x70] sm:$0xff] }
  0x2a   : > { %567 = vmatprep.subr.mxu0 %v744_v0  ;;  %599 = vmatprep.mubr.msk.f32.mxu0 %vm745_vm0, %v744_v0  ;;  %v264_v3 = vld [vmem:[#allocation2 + $0x68] sm:$0xff]  ;;  %v263_v4 = vld [vmem:[#allocation2 + $0x60] sm:$0xff]  ;;  %v364_v5 = vld [vmem:[#allocation4 + $0x78] sm:$0xff]  ;;  %p242_p2 = scmp.lt.s32.totalorder %s782_s19, 1 }
  0x2b   : > { %602 = vmatprep.subr.mxu1 %v744_v0  ;;  %634 = vmatprep.mubr.msk.f32.mxu1 %vm745_vm0, %v744_v0  ;;  %v262_v6 = vld [vmem:[#allocation2 + $0x58] sm:$0xff]  ;;  %v363_v7 = vld [vmem:[#allocation4 + $0x70] sm:$0xff]  ;;  %v362_v8 = vld [vmem:[#allocation4 + $0x68] sm:$0xff] }
  0x2c   : > { %568 = vmatpush3.msra.mxu0 %v266_v1  ;;  %603 = vmatpush3.msra.mxu1 %v364_v5  ;;  %v261_v9 = vld [vmem:[#allocation2 + $0x50] sm:$0xff]  ;;  %v361_v10 = vld [vmem:[#allocation4 + $0x60] sm:$0xff]  ;;  %v260_v11 = vld [vmem:[#allocation2 + $0x48] sm:$0xff]  ;;  %s894_s19 = smov (!%p242_p2, %s782_s19), 1 }
  0x2d   : > { %569 = vmatprep.subr.mxu0 %v744_v0  ;;  %604 = vmatprep.subr.mxu1 %v744_v0  ;;  %v259_v12 = vld [vmem:[#allocation2 + $0x40] sm:$0xff]  ;;  %v258_v13 = vld [vmem:[#allocation2 + $0x38] sm:$0xff]  ;;  %v257_v14 = vld [vmem:[#allocation2 + $0x30] sm:$0xff]  ;;  %s527_s9 = sshll.u32 %s894_s19, 3 }
  0x2e   : > { %570 = vmatpush3.msra.mxu0 %v265_v2  ;;  %605 = vmatpush3.msra.mxu1 %v363_v7  ;;  %v256_v15 = vld [vmem:[#allocation2 + $0x28] sm:$0xff]  ;;  %v255_v16 = vld [vmem:[#allocation2 + $0x20] sm:$0xff]  ;;  %v254_v17 = vld [vmem:[#allocation2 + $0x18] sm:$0xff]  ;;  %s245_s12 = scalar_lea.vmem %s885_s0, %s527_s9  ;;  %s249_s21 = scalar_lea.vmem %s890_s5, %s527_s9 }
  0x2f   : > { %571 = vmatprep.subr.mxu0 %v744_v0  ;;  %606 = vmatprep.subr.mxu1 %v744_v0  ;;  %v253_v18 = vld [vmem:[#allocation2 + $0x10] sm:$0xff]  ;;  %v252_v19 = vld [vmem:[#allocation2 + $0x8] sm:$0xff]  ;;  %v251_v20 = vld [vmem:[#allocation2] sm:$0xff] }
  0x30   : > { %572 = vmatpush3.msra.mxu0 %v264_v3  ;;  %607 = vmatpush3.msra.mxu1 %v362_v8  ;;  %v250_v21 = vld [vmem:[%s245_s12] sm:$0xff]  ;;  %v360_v22 = vld [vmem:[#allocation4 + $0x58] sm:$0xff]  ;;  %v359_v23 = vld [vmem:[#allocation4 + $0x50] sm:$0xff] }
  0x31   : > { %573 = vmatprep.subr.mxu0 %v744_v0  ;;  %608 = vmatprep.subr.mxu1 %v744_v0  ;;  %v358_v24 = vld [vmem:[#allocation4 + $0x48] sm:$0xff]  ;;  %v357_v25 = vld [vmem:[#allocation4 + $0x40] sm:$0xff]  ;;  %v356_v26 = vld [vmem:[#allocation4 + $0x38] sm:$0xff] }
  0x32   : > { %574 = vmatpush3.msra.mxu0 %v263_v4  ;;  %609 = vmatpush3.msra.mxu1 %v361_v10  ;;  %v355_v27 = vld [vmem:[#allocation4 + $0x30] sm:$0xff]  ;;  %v354_v28 = vld [vmem:[#allocation4 + $0x28] sm:$0xff]  ;;  %v353_v29 = vld [vmem:[#allocation4 + $0x20] sm:$0xff] }
  0x33   : > { %575 = vmatprep.subr.mxu0 %v744_v0  ;;  %610 = vmatprep.subr.mxu1 %v744_v0  ;;  %v352_v30 = vld [vmem:[#allocation4 + $0x18] sm:$0xff]  ;;  %v351_v31 = vld [vmem:[#allocation4 + $0x10] sm:$0xff]  ;;  %v350_v32 = vld [vmem:[#allocation4 + $0x8] sm:$0xff] }
  0x34   : > { %576 = vmatpush3.msra.mxu0 %v262_v6  ;;  %611 = vmatpush3.msra.mxu1 %v360_v22  ;;  %v349_v33 = vld [vmem:[#allocation4] sm:$0xff] }
  0x35   : > { %577 = vmatprep.subr.mxu0 %v744_v0  ;;  %612 = vmatprep.subr.mxu1 %v744_v0  ;;  %v529_v34 = vld [vmem:[%s887_s2] ss:$0 sm:$0xff] }
  0x36   : > { %578 = vmatpush3.msra.mxu0 %v261_v9  ;;  %613 = vmatpush3.msra.mxu1 %v359_v23  ;;  %v530_v43 = vld [vmem:[%s889_s4] ss:$0 sm:$0xff] }
  0x37   : > { %579 = vmatprep.subr.mxu0 %v744_v0  ;;  %614 = vmatprep.subr.mxu1 %v744_v0 }
  0x38   : > { %580 = vmatpush3.msra.mxu0 %v260_v11  ;;  %615 = vmatpush3.msra.mxu1 %v358_v24 }
  0x39   : > { %581 = vmatprep.subr.mxu0 %v744_v0  ;;  %616 = vmatprep.subr.mxu1 %v744_v0 }
  0x3a   : > { %582 = vmatpush3.msra.mxu0 %v259_v12  ;;  %617 = vmatpush3.msra.mxu1 %v357_v25 }
  0x3b   : > { %583 = vmatprep.subr.mxu0 %v744_v0  ;;  %618 = vmatprep.subr.mxu1 %v744_v0 }
  0x3c   : > { %584 = vmatpush3.msra.mxu0 %v258_v13  ;;  %619 = vmatpush3.msra.mxu1 %v356_v26 }
  0x3d   : > { %585 = vmatprep.subr.mxu0 %v744_v0  ;;  %620 = vmatprep.subr.mxu1 %v744_v0 }
  0x3e   : > { %586 = vmatpush3.msra.mxu0 %v257_v14  ;;  %621 = vmatpush3.msra.mxu1 %v355_v27 }
  0x3f   : > { %587 = vmatprep.subr.mxu0 %v744_v0  ;;  %622 = vmatprep.subr.mxu1 %v744_v0 }
  0x40   : > { %588 = vmatpush3.msra.mxu0 %v256_v15  ;;  %623 = vmatpush3.msra.mxu1 %v354_v28 }
  0x41   : > { %589 = vmatprep.subr.mxu0 %v744_v0  ;;  %624 = vmatprep.subr.mxu1 %v744_v0 }
  0x42   : > { %590 = vmatpush3.msra.mxu0 %v255_v16  ;;  %625 = vmatpush3.msra.mxu1 %v353_v29 }
  0x43   : > { %591 = vmatprep.subr.mxu0 %v744_v0  ;;  %626 = vmatprep.subr.mxu1 %v744_v0 }
  0x44   : > { %592 = vmatpush3.msra.mxu0 %v254_v17  ;;  %627 = vmatpush3.msra.mxu1 %v352_v30 }
  0x45   : > { %593 = vmatprep.subr.mxu0 %v744_v0  ;;  %628 = vmatprep.subr.mxu1 %v744_v0 }
  0x46   : > { %594 = vmatpush3.msra.mxu0 %v253_v18  ;;  %629 = vmatpush3.msra.mxu1 %v351_v31 }
  0x47   : > { %595 = vmatprep.subr.mxu0 %v744_v0  ;;  %630 = vmatprep.subr.mxu1 %v744_v0 }
  0x48   : > { %596 = vmatpush3.msra.mxu0 %v252_v19  ;;  %631 = vmatpush3.msra.mxu1 %v350_v32 }
  0x49   : > { %597 = vmatprep.subr.mxu0 %v744_v0  ;;  %632 = vmatprep.subr.mxu1 %v744_v0 }
  0x4a   : > { %598 = vmatpush3.msra.mxu0 %v251_v20  ;;  %633 = vmatpush3.msra.mxu1 %v349_v33 }
  0x4b   : > { %600 = vmatmul.mubr.f32.vlgmr.msra.gmra.mxu0 %v250_v21 }
 0x10b   : > { %v340_v35 = vpop.f32.mrf.mxu0 }
 0x10c   : > { %v341_v36 = vadd.f32 %v529_v34, %v340_v35 }
 0x10d   : > { %v601_v37 = vpop.f32.mrf.mxu0 }
 0x10e   : > { %v345_v38 = vmul.f32 0.70710677, %v341_v36  ;;  %v344_v40 = vmul.f32 0.5, %v341_v36 }
 0x110   : > { %670 = verf.f32 %v345_v38 }
 0x11d   : > { %v671_v39 = vpop.eup %670 }
 0x11e   : > { %v347_v41 = vadd.f32 1.0, %v671_v39 }
 0x120   : > { %v348_v42 = vmul.f32 %v347_v41, %v344_v40 }
 0x122   : > { %635 = vmatmul.mubr.f32.vlgmr.msra.gmra.mxu1 %v348_v42 }
 0x1e2   : > { %v438_v44 = vpop.f32.mrf.mxu1 }
 0x1e3   : > { %v439_v45 = vadd.f32 %v530_v43, %v438_v44 }
 0x1e4   : > { %v636_v46 = vpop.f32.mrf.mxu1 }
 0x1e5   : > { %442 = vst [vmem:[%s249_s21] sm:$0xff] %v439_v45 }
 0x1e6 PF: > { %s17_s18 = sadd.s32 1, %s738_s18  }
 0x1e7   : > { %p14_p3 = scmp.ge.s32.totalorder %s17_s18, 4  }
 0x1e9   :  { %16 = sbr.rel (!%p14_p3) target bundleno = 2 (0x2), region = 79 }
 0x1ee   :  { %462 = vsyncpa [#allocation3], 1 }
 0x1ef   :  { %464 = vsyncpa [#allocation3 + $0x1], 1 }
 0x1f0   :  { %465 = vsyncpa [#allocation5], 1 }

</bundles_post_ra>
